<compile_context>
chip_gen: v5e
topology: v5e:2x2
jax: 0.10.0
libtpu: 0.0.40
codegen_flags: <defaults>
</compile_context>

<pallas_src>
import jax
import jax.numpy as jnp
from jax.experimental import pallas as pl
from jax.experimental.pallas import tpu as pltpu


def _patch_embed_kernel(x_ref, w_ref, b_ref, o_ref):
    # x_ref: (TM, K) activation tile (compute dtype, pipelined per grid step)
    # w_ref: (K, N)  weight, VMEM-resident across the grid (compute dtype)
    # b_ref: (1, N)  bias, float32
    # o_ref: (TM, N) output tile (out dtype)
    acc = jnp.dot(x_ref[...], w_ref[...], preferred_element_type=jnp.float32)
    o_ref[...] = (acc + b_ref[...]).astype(o_ref.dtype)


def _round_up(a, b):
    return (a + b - 1) // b * b


def _pick_tile_m(M, cap, sub):
    """Pick an M-tile: multiple of `sub`, <= cap, ideally dividing M exactly
    (padding-free => post-kernel slice is a no-op view), ideally >= 2 grid
    steps so v7x can split the grid across its 2 TensorCores."""
    cap = max(sub, (int(cap) // sub) * sub)
    divisors = [d for d in range(sub, min(cap, M) + 1, sub) if M % d == 0]
    if divisors:
        multi = [d for d in divisors if M // d >= 2]
        return max(multi) if multi else max(divisors)
    # No padding-free tile exists: single padded step if it fits, else cap.
    return min(cap, _round_up(M, sub)) if M <= cap else cap


def patch_embed_forward(x, weight, bias, patch_size, *,
                        compute_dtype=None, out_dtype=None,
                        output_format="NCHW", tile_m=1024,
                        vmem_budget_bytes=14 << 20):
    """Equivalent of PatchEmbed.forward (the Conv2d projection).

    x:      (B, C, H, W)   NCHW input
    weight: (E, C, ph, pw) PyTorch Conv2d weight layout
    bias:   (E,)
    compute_dtype: optional MXU operand dtype (e.g. jnp.bfloat16).  Bias add
                   and accumulation stay float32.  Recommended bf16 for real
                   StyTr2 shapes on v5e/v6e/v7x.
    out_dtype:     optional output dtype (e.g. jnp.bfloat16 when the
                   downstream transformer runs bf16).
    output_format: "NCHW" (PyTorch-faithful, default), "NHWC", or "seq"
                   ((B, Hp*Wp, E), skips the output transpose entirely).
    """
    B, C, H, W = x.shape
    E = weight.shape[0]
    ph, pw = patch_size
    Hp, Wp = H // ph, W // pw
    M = B * Hp * Wp
    K = C * ph * pw

    orig_dtype = x.dtype
    cdtype = jnp.dtype(compute_dtype) if compute_dtype is not None else jnp.dtype(orig_dtype)
    odtype = jnp.dtype(out_dtype) if out_dtype is not None else jnp.dtype(orig_dtype)

    # Cast *before* the im2col rearrangement so that pass moves compute-dtype
    # bytes (XLA fuses the convert into the transpose).
    if cdtype != x.dtype:
        x = x.astype(cdtype)

    # --- im2col glue: one fused XLA cast+transpose pass ---------------------
    # (B, C, Hp, ph, Wp, pw) -> (B, Hp, Wp, C, ph, pw) -> (M, K)
    # TODO(synk): callers that keep activations NHWC (or consume the "seq"
    # output) can drop this pass and the final NCHW transpose for another ~2x
    # on this memory-bound step.
    patches = x.reshape(B, C, Hp, ph, Wp, pw)
    patches = jnp.transpose(patches, (0, 2, 4, 1, 3, 5)).reshape(M, K)

    # Conv2d weight (E, C, ph, pw) -> matmul weight (K, E); bias stays f32.
    w_mat = weight.reshape(E, K).T.astype(cdtype)
    b_mat = bias.reshape(1, E).astype(jnp.float32)

    # --- tile selection ------------------------------------------------------
    # Sublane granule: 8 rows for 4-byte, 16 for 2-byte, 32 for 1-byte dtypes.
    min_item = max(1, min(4, cdtype.itemsize, odtype.itemsize))
    sub = 8 * (4 // min_item)

    # VMEM cap: double-buffered activation + output tiles plus the resident
    # (double-buffered) weight must fit the smallest scoped-VMEM default.
    per_row = 2 * K * cdtype.itemsize + 2 * E * odtype.itemsize
    resident = 2 * K * E * cdtype.itemsize + 2 * E * 4
    rows_cap = max(sub, (vmem_budget_bytes - resident) // max(per_row, 1))
    TM = _pick_tile_m(M, min(int(tile_m), int(rows_cap)), sub)

    M_pad = _round_up(M, TM)
    if M_pad != M:
        patches = jnp.pad(patches, ((0, M_pad - M), (0, 0)))
    grid_m = M_pad // TM

    # N stays unpadded (see header note); lane-dense automatically when E%128==0.
    N = E

    out = pl.pallas_call(
        _patch_embed_kernel,
        out_shape=jax.ShapeDtypeStruct((M_pad, N), odtype),
        grid_spec=pltpu.PrefetchScalarGridSpec(
            num_scalar_prefetch=0,
            grid=(grid_m,),
            in_specs=[
                # activations: one M-tile per grid step (software-pipelined)
                pl.BlockSpec((TM, K), lambda i: (i, 0)),
                # weight + bias: resident across the whole grid
                pl.BlockSpec((K, N), lambda i: (0, 0)),
                pl.BlockSpec((1, N), lambda i: (0, 0)),
            ],
            out_specs=pl.BlockSpec((TM, N), lambda i: (i, 0)),
        ),
        compiler_params=pltpu.CompilerParams(
            # Independent M tiles -> shard across TCs on v7x; no-op on v5e/v6e.
            dimension_semantics=("parallel",)),
    )(patches, w_mat, b_mat)

    if M_pad != M:
        out = out[:M]
    out = out.reshape(B, Hp, Wp, E)          # free view when no M padding

    if output_format == "NHWC":
        return out
    if output_format == "seq":               # (B, num_patches, E), no transpose
        return out.reshape(B, Hp * Wp, E)
    # PyTorch-faithful NCHW (costs one extra read+write of the output in HBM).
    return jnp.transpose(out, (0, 3, 1, 2))


def _conv_reference(x, weight, bias, patch):
    ref = jax.lax.conv_general_dilated(
        x, weight, window_strides=patch, padding="VALID",
        dimension_numbers=("NCHW", "OIHW", "NCHW"),
    ) + bias.reshape(1, -1, 1, 1)
    return jax.block_until_ready(ref)


if __name__ == "__main__":
    patch = (8, 8)
    E = 32
    key = jax.random.PRNGKey(0)

    # --- config 1: B=2, C=4, 16x16 (single grid step) -----------------------
    B, C, H, W = 2, 4, 16, 16
    kx, kw, kb = jax.random.split(key, 3)
    x = jax.random.normal(kx, (B, C, H, W), dtype=jnp.float32)
    weight = jax.random.normal(kw, (E, C, patch[0], patch[1]),
                               dtype=jnp.float32) * 0.02
    bias = jax.random.normal(kb, (E,), dtype=jnp.float32) * 0.02
    ref = _conv_reference(x, weight, bias, patch)

    # f32 path, NCHW output: tight check against the conv reference.
    out = jax.block_until_ready(patch_embed_forward(x, weight, bias, patch))
    assert out.shape == (B, E, H // patch[0], W // patch[1]), out.shape
    assert jnp.allclose(out, ref, atol=1e-4, rtol=1e-4), (
        float(jnp.max(jnp.abs(out - ref))))

    # bf16 operands + bf16 output + "seq" layout: looser check.
    out_seq = jax.block_until_ready(
        patch_embed_forward(x, weight, bias, patch,
                            compute_dtype=jnp.bfloat16,
                            out_dtype=jnp.bfloat16,
                            output_format="seq"))
    Hp, Wp = H // patch[0], W // patch[1]
    ref_seq = jnp.transpose(ref, (0, 2, 3, 1)).reshape(B, Hp * Wp, E)
    assert out_seq.shape == (B, Hp * Wp, E), out_seq.shape
    assert jnp.allclose(out_seq.astype(jnp.float32), ref_seq,
                        atol=5e-2, rtol=5e-2), (
        float(jnp.max(jnp.abs(out_seq.astype(jnp.float32) - ref_seq))))

    # --- config 2: 32x32 image -> M=32, divisor tiling gives grid_m=2 --------
    B2, H2, W2 = 2, 32, 32
    kx2 = jax.random.fold_in(kx, 1)
    x2 = jax.random.normal(kx2, (B2, C, H2, W2), dtype=jnp.float32)
    ref2 = _conv_reference(x2, weight, bias, patch)
    out2 = jax.block_until_ready(patch_embed_forward(x2, weight, bias, patch))
    assert out2.shape == (B2, E, H2 // patch[0], W2 // patch[1]), out2.shape
    assert jnp.allclose(out2, ref2, atol=1e-4, rtol=1e-4), (
        float(jnp.max(jnp.abs(out2 - ref2))))

    print("KERNEL_OK")
</pallas_src>

<mosaic_0001>
module attributes {stable_mosaic.version = 11 : i64} {
  func.func @_patch_embed_kernel(%arg0: i32, %arg1: memref<8x256xf32, #tpu.memory_space<vmem>>, %arg2: memref<256x32xf32, #tpu.memory_space<vmem>>, %arg3: memref<1x32xf32, #tpu.memory_space<vmem>>, %arg4: memref<8x32xf32, #tpu.memory_space<vmem>>) attributes {dimension_semantics = [#tpu.dimension_semantics<parallel>], iteration_bounds = array<i64: 1>, scalar_prefetch = 0 : i64, scratch_operands = 0 : i64, tpu.core_type = #tpu.core_type<tc>, window_params = [{transform_indices = @transform_0, window_bounds = array<i64: 8, 256>}, {pipeline_mode = #tpu.pipeline_mode<synchronous>, transform_indices = @transform_1, window_bounds = array<i64: 256, 32>}, {pipeline_mode = #tpu.pipeline_mode<synchronous>, transform_indices = @transform_2, window_bounds = array<i64: 1, 32>}, {transform_indices = @transform_3, window_bounds = array<i64: 8, 32>}]} {
    %c0 = arith.constant 0 : index
    %c0_0 = arith.constant 0 : index
    %0 = vector.load %arg1[%c0, %c0_0] : memref<8x256xf32, #tpu.memory_space<vmem>>, vector<8x256xf32>
    %c0_1 = arith.constant 0 : index
    %c0_2 = arith.constant 0 : index
    %1 = vector.load %arg2[%c0_1, %c0_2] : memref<256x32xf32, #tpu.memory_space<vmem>>, vector<256x32xf32>
    %cst = arith.constant dense<0.000000e+00> : vector<8x32xf32>
    %2 = tpu.matmul %0, %1, %cst {dimension_numbers = #tpu.dot_dimension_numbers<[1], [0], [0], [1], [0, 0, 1, 1], [], []>} : vector<8x256xf32>, vector<256x32xf32>, vector<8x32xf32> -> vector<8x32xf32>
    %c0_3 = arith.constant 0 : index
    %c0_4 = arith.constant 0 : index
    %3 = vector.load %arg3[%c0_3, %c0_4] : memref<1x32xf32, #tpu.memory_space<vmem>>, vector<1x32xf32>
    %4 = vector.broadcast %3 : vector<1x32xf32> to vector<8x32xf32>
    %5 = arith.addf %2, %4 : vector<8x32xf32>
    %c0_5 = arith.constant 0 : index
    %c0_6 = arith.constant 0 : index
    %6 = vector.load %arg4[%c0_5, %c0_6] : memref<8x32xf32, #tpu.memory_space<vmem>>, vector<8x32xf32>
    tpu.vector_store %arg4[%c0_5, %c0_6], %5 {strides = array<i32>} : memref<8x32xf32, #tpu.memory_space<vmem>>, vector<8x32xf32>,
    return
  }
  func.func @transform_0(%arg0: i32) -> (i32, i32) {
    %c0_i32 = arith.constant 0 : i32
    %c0_i32_0 = arith.constant 0 : i32
    return %arg0, %c0_i32 : i32, i32
  }
  func.func @transform_1(%arg0: i32) -> (i32, i32) {
    %c0_i32 = arith.constant 0 : i32
    %c0_i32_0 = arith.constant 0 : i32
    %c0_i32_1 = arith.constant 0 : i32
    return %c0_i32, %c0_i32_0 : i32, i32
  }
  func.func @transform_2(%arg0: i32) -> (i32, i32) {
    %c0_i32 = arith.constant 0 : i32
    %c0_i32_0 = arith.constant 0 : i32
    %c0_i32_1 = arith.constant 0 : i32
    return %c0_i32, %c0_i32_0 : i32, i32
  }
  func.func @transform_3(%arg0: i32) -> (i32, i32) {
    %c0_i32 = arith.constant 0 : i32
    %c0_i32_0 = arith.constant 0 : i32
    return %arg0, %c0_i32 : i32, i32
  }
}

</mosaic_0001>

<bundles_post_ra>
// kernel: tpu_custom_call.1
= control target key start
LH: loop header
LB: loop body
LE: loop exit
PB: predicated region body
PF: predicated region fallthrough
CT: control target
= control target key end

     0   :  { %s268_s0 = inlined_call_operand.vmem [shape: f32[8,256], index: 0, kind: input, shape index: {}]   ;;  %s269_s1 = inlined_call_operand.vmem [shape: f32[256,32], index: 1, kind: input, shape index: {}]   ;;  %s270_s2 = inlined_call_operand.vmem [shape: f32[1,32], index: 2, kind: input, shape index: {}]   ;;  %s271_s3 = inlined_call_operand.hbm [shape: f32[8,32], index: 3, kind: output, shape index: {}]  }
   0x1   :  { %v32_v0 = vld [vmem:[%s269_s1 + $0x78] sm:$0xff]  ;;  %v31_v1 = vld [vmem:[%s269_s1 + $0x70] sm:$0xff]  ;;  %v30_v4 = vld [vmem:[%s269_s1 + $0x68] sm:$0xff] }
   0x2   :  { %v48_v2 = vld [vmem:[%s269_s1 + $0xf8] sm:$0xff]  ;;  %53 = vmatpush.msra.mxu0 %v32_v0  ;;  %v47_v3 = vld [vmem:[%s269_s1 + $0xf0] sm:$0xff]  ;;  %v46_v5 = vld [vmem:[%s269_s1 + $0xe8] sm:$0xff] }
   0x3   :  { %73 = vmatpush.msra.mxu1 %v48_v2  ;;  %v29_v6 = vld [vmem:[%s269_s1 + $0x60] sm:$0xff]  ;;  %v28_v8 = vld [vmem:[%s269_s1 + $0x58] sm:$0xff]  ;;  %v27_v10 = vld [vmem:[%s269_s1 + $0x50] sm:$0xff] }
   0x4   :  { %54 = vmatpush.msra.mxu0 %v31_v1  ;;  %v45_v7 = vld [vmem:[%s269_s1 + $0xe0] sm:$0xff]  ;;  %v44_v9 = vld [vmem:[%s269_s1 + $0xd8] sm:$0xff]  ;;  %v43_v11 = vld [vmem:[%s269_s1 + $0xd0] sm:$0xff] }
   0x5   :  { %74 = vmatpush.msra.mxu1 %v47_v3  ;;  %v26_v12 = vld [vmem:[%s269_s1 + $0x48] sm:$0xff]  ;;  %v25_v14 = vld [vmem:[%s269_s1 + $0x40] sm:$0xff] }
   0x6   :  { %55 = vmatpush.msra.mxu0 %v30_v4  ;;  %v42_v13 = vld [vmem:[%s269_s1 + $0xc8] sm:$0xff]  ;;  %v41_v15 = vld [vmem:[%s269_s1 + $0xc0] sm:$0xff] }
   0x7   :  { %75 = vmatpush.msra.mxu1 %v46_v5 }
   0x8   :  { %56 = vmatpush.msra.mxu0 %v29_v6 }
   0x9   :  { %76 = vmatpush.msra.mxu1 %v45_v7 }
   0xa   :  { %57 = vmatpush.msra.mxu0 %v28_v8 }
   0xb   :  { %77 = vmatpush.msra.mxu1 %v44_v9 }
   0xc   :  { %58 = vmatpush.msra.mxu0 %v27_v10 }
   0xd   :  { %78 = vmatpush.msra.mxu1 %v43_v11 }
   0xe   :  { %8 = vsyncpa [#allocation3], 0  ;;  %59 = vmatpush.msra.mxu0 %v26_v12  ;;  %v24_v16 = vld [vmem:[%s269_s1 + $0x38] sm:$0xff]  ;;  %v23_v18 = vld [vmem:[%s269_s1 + $0x30] sm:$0xff]  ;;  %s102_s4 = sshll.u32 %s271_s3, 4  ;;  %vm93_vm0 = vcmask 261120   ;;  %s103_s4 = int_to_ptr.hbm [resolvable:$true] %s102_s4 }
   0xf   :  { %79 = vmatpush.msra.mxu1 %v42_v13  ;;  %v40_v17 = vld [vmem:[%s269_s1 + $0xb8] sm:$0xff]  ;;  %v39_v19 = vld [vmem:[%s269_s1 + $0xb0] sm:$0xff]  ;;  %v22_v20 = vld [vmem:[%s269_s1 + $0x28] sm:$0xff] }
  0x10   :  { %60 = vmatpush.msra.mxu0 %v25_v14  ;;  %v38_v21 = vld [vmem:[%s269_s1 + $0xa8] sm:$0xff]  ;;  %v21_v22 = vld [vmem:[%s269_s1 + $0x20] sm:$0xff]  ;;  %v20_v24 = vld [vmem:[%s269_s1 + $0x18] sm:$0xff] }
  0x11   :  { %80 = vmatpush.msra.mxu1 %v41_v15  ;;  %v37_v23 = vld [vmem:[%s269_s1 + $0xa0] sm:$0xff]  ;;  %v36_v25 = vld [vmem:[%s269_s1 + $0x98] sm:$0xff]  ;;  %v19_v26 = vld [vmem:[%s269_s1 + $0x10] sm:$0xff] }
  0x12   :  { %61 = vmatpush.msra.mxu0 %v24_v16  ;;  %v35_v27 = vld [vmem:[%s269_s1 + $0x90] sm:$0xff]  ;;  %v18_v28 = vld [vmem:[%s269_s1 + $0x8] sm:$0xff]  ;;  %v17_v30 = vld [vmem:[%s269_s1] sm:$0xff] }
  0x13   :  { %81 = vmatpush.msra.mxu1 %v40_v17  ;;  %v34_v29 = vld [vmem:[%s269_s1 + $0x88] sm:$0xff]  ;;  %v33_v31 = vld [vmem:[%s269_s1 + $0x80] sm:$0xff]  ;;  %s139_s1 = smov [#allocation2]  }
  0x14   :  { %62 = vmatpush.msra.mxu0 %v23_v18  ;;  %v15_v32 = vld [vmem:[%s268_s0] sm:$0xff]  ;;  %v16_v33 = vld [vmem:[%s268_s0 + $0x8] sm:$0xff]  ;;  %s100_s28 = sshll.u32 %s139_s1, 4  ;;  %s101_s28 = int_to_ptr.vmem [resolvable:$true] %s100_s28 }
  0x15   :  { %82 = vmatpush.msra.mxu1 %v39_v19  ;;  %v112_v34 = vld [vmem:[%s270_s2] ss:$0 sm:$0xff] }
  0x16   :  { %63 = vmatpush.msra.mxu0 %v22_v20 }
  0x17   :  { %83 = vmatpush.msra.mxu1 %v38_v21 }
  0x18   :  { %64 = vmatpush.msra.mxu0 %v21_v22 }
  0x19   :  { %84 = vmatpush.msra.mxu1 %v37_v23 }
  0x1a   :  { %65 = vmatpush.msra.mxu0 %v20_v24 }
  0x1b   :  { %85 = vmatpush.msra.mxu1 %v36_v25 }
  0x1c   :  { %66 = vmatpush.msra.mxu0 %v19_v26 }
  0x1d   :  { %86 = vmatpush.msra.mxu1 %v35_v27 }
  0x1e   :  { %67 = vmatpush.msra.mxu0 %v18_v28 }
  0x1f   :  { %87 = vmatpush.msra.mxu1 %v34_v29 }
  0x20   :  { %68 = vmatpush.msra.mxu0 %v17_v30 }
  0x21   :  { %88 = vmatpush.msra.mxu1 %v33_v31  ;;  %69 = vmatmul.f32.vlgmr.msra.gmra.mxu0 %v15_v32 }
  0x22   :  { %89 = vmatmul.f32.vlgmr.msra.gmra.mxu1 %v16_v33 }
  0x9e   :  { %v70_v35 = vpop.f32.mrf.mxu0 }
  0x9f   :  { %v90_v36 = vpop.f32.mrf.mxu1  ;;  %v71_v37 = vadd.f32 %v112_v34, %v70_v35 }
  0xa1   :  { %v91_v38 = vadd.f32 %v90_v36, %v71_v37 }
  0xa3   :  { %94 = vst.msk [vmem:[#allocation2] sm:$0xff] %vm93_vm0, %v91_v38 }
  0xa4   :  { %105 = dma.vmem_to_hbm [thread:$0]  %s101_s28, 128, %s103_s4, [#allocation3]  }
  0xa5   :  { %137 = dma.done.wait [#allocation3], 128  }
  0xa6   :  { %138 = vsyncadd [#allocation3], 4294967168 }
  0xa7   :  { %110 = vsyncpa [#allocation3], 1 }

</bundles_post_ra>
